<compile_context>
chip_gen: v5e
topology: v5e:2x2
jax: 0.10.0
libtpu: 0.0.40
codegen_flags: <defaults>
</compile_context>

<pallas_src>
import functools

import jax
import jax.numpy as jnp
from jax.experimental import pallas as pl
from jax.experimental.pallas import tpu as pltpu


_WHOLE_ARRAY_BUDGET = 8 << 20    # single-block fast path if in+out fit here
_TILE_BUDGET = 12 << 20          # pipelined (double-buffered) footprint budget
_VMEM_LIMIT_CAP = 48 << 20       # never raise scoped VMEM past this (v7x: 64 MiB phys)


def _sigmoid(slope, x):
    # sigmoid(z) == 0.5 * tanh(z / 2) + 0.5   (exact identity).
    # tanh lowers to the EUP (its own VLIW slot) instead of the VALU f32
    # divide sequence that jax.nn.sigmoid's 1/(1+exp(-z)) would need.
    return 0.5 * jnp.tanh((0.5 * slope) * x) + 0.5


def _fftshift_axis(x, size, axis):
    """fftshift (roll by size // 2) along a static axis of a VMEM tile."""
    shift = size // 2
    if shift == 0:
        return x
    is_lane_axis = axis in (x.ndim - 1, -1)
    align = 128 if is_lane_axis else 8
    if size % align == 0:
        # Aligned (even) sizes: XLU rotate; +size//2 == -size//2 mod size,
        # so roll direction is immaterial.
        return pltpu.roll(x, shift=shift, axis=axis)
    # Unaligned / tiny / odd sizes: static roll == slice + concat.
    return jnp.roll(x, shift, axis=axis)


def _stream_kernel(slope_ref, in_ref, out_ref):
    # Both halves of the fftshift are folded into the input index_map:
    # pure cast + sigmoid streaming kernel with lane-dense stores.
    x = in_ref[...].astype(jnp.float32)
    out_ref[...] = _sigmoid(slope_ref[0], x)


def _wroll_kernel(w, slope_ref, in_ref, out_ref):
    # H-half of the fftshift folded into the input index_map; only the
    # W-half remains in-kernel.
    x = in_ref[...].astype(jnp.float32)
    out_ref[...] = _fftshift_axis(_sigmoid(slope_ref[0], x), w, axis=1)


def _full_kernel(h, w, slope_ref, in_ref, out_ref):
    # Whole-array fast path / fallback: both rolls in-kernel.
    x = in_ref[...].astype(jnp.float32)
    prob = _sigmoid(slope_ref[0], x)
    prob = _fftshift_axis(prob, h, axis=0)
    out_ref[...] = _fftshift_axis(prob, w, axis=1)


def _pick_block_h(h, bytes_per_row, budget_bytes):
    """Largest block_h that (a) is a multiple of 8, (b) divides H//2 so the
    H-half of the fftshift is an exact block-level rotation, and (c) keeps the
    double-buffered in+out footprint under `budget_bytes`.  Prefers
    block_h = H//2 (exactly 2 grid steps).  num_blocks = H / block_h is then
    always even (good for v7x 2-TC 'parallel' sharding)."""
    if h % 16 != 0:
        return None
    half = h // 2
    best = None
    b = 8
    while b <= half:
        if half % b == 0 and b * bytes_per_row <= budget_bytes:
            best = b
        b += 8
    if best is None:
        best = 8   # best effort for extremely wide masks; half % 8 == 0 here
    return best


def prob_mask_multi_accn_forward(mask_logits, x, slope=5.0,
                                 whole_array_budget_bytes=_WHOLE_ARRAY_BUDGET,
                                 tile_budget_bytes=_TILE_BUDGET):
    """Forward pass of ProbMaskMutliAccn.

    Args:
      mask_logits: learnable logits with H * W elements (the nn.Parameter),
                   any float dtype (cast to f32 in-vreg inside the kernel).
      x:           input tensor; only x.shape[-2], x.shape[-1] are used.
      slope:       LOUPE slope (runtime scalar; no recompile when it changes).

    Returns:
      (1, H, W) float32 probability mask, fftshifted over the last two dims.
    """
    h, w = int(x.shape[-2]), int(x.shape[-1])
    logits = mask_logits.reshape(h, w)                    # native dtype
    in_b = logits.dtype.itemsize
    out_b = 4
    total_bytes = h * w * (in_b + out_b)

    slope_arr = jnp.reshape(jnp.asarray(slope, dtype=jnp.float32), (1,))
    cost = pl.CostEstimate(
        flops=3 * h * w, transcendentals=h * w, bytes_accessed=total_bytes
    )
    smem_spec = pl.BlockSpec(memory_space=pltpu.MemorySpace.SMEM)

    # --- path selection -----------------------------------------------------
    # Tiled streaming only pays off for large masks with lane-dense (>=128)
    # rows; everything else takes the single-block path (no per-step overhead).
    block_h = None
    fold_w = False
    if total_bytes > whole_array_budget_bytes and w >= 128:
        fold_w = (w % 256 == 0)
        w_cols = (w // 2) if fold_w else w
        bytes_per_row = 2 * w_cols * (in_b + out_b)       # 2x double-buffered
        block_h = _pick_block_h(h, bytes_per_row, tile_budget_bytes)

    if block_h is not None:
        nbh = h // block_h
        sh_h = nbh // 2          # H//2 measured in blocks (exact: block_h | H//2)
        if fold_w:
            # Both shift halves folded into the input index_map; 2-D grid with
            # two lane-aligned W/2 column blocks.
            out2d = pl.pallas_call(
                _stream_kernel,
                out_shape=jax.ShapeDtypeStruct((h, w), jnp.float32),
                grid=(nbh, 2),
                in_specs=[
                    smem_spec,
                    pl.BlockSpec(
                        (block_h, w // 2),
                        lambda i, j: ((i + sh_h) % nbh, (j + 1) % 2),
                    ),
                ],
                out_specs=pl.BlockSpec((block_h, w // 2), lambda i, j: (i, j)),
                compiler_params=pltpu.CompilerParams(
                    dimension_semantics=("parallel", "parallel")
                ),
                cost_estimate=cost,
            )(slope_arr, logits)
        else:
            out2d = pl.pallas_call(
                functools.partial(_wroll_kernel, w),
                out_shape=jax.ShapeDtypeStruct((h, w), jnp.float32),
                grid=(nbh,),
                in_specs=[
                    smem_spec,
                    pl.BlockSpec((block_h, w),
                                 lambda i: ((i + sh_h) % nbh, 0)),
                ],
                out_specs=pl.BlockSpec((block_h, w), lambda i: (i, 0)),
                compiler_params=pltpu.CompilerParams(
                    dimension_semantics=("parallel",)
                ),
                cost_estimate=cost,
            )(slope_arr, logits)
    else:
        cp = None
        if total_bytes > (12 << 20):
            # Large unusual shapes (odd H, narrow W): raise the scoped VMEM
            # limit but stay well under v7x's 64 MiB physical ceiling.
            cp = pltpu.CompilerParams(
                vmem_limit_bytes=min(int(total_bytes * 1.5) + (1 << 20),
                                     _VMEM_LIMIT_CAP)
            )
            # TODO(synk): pad-and-slice to restore the pipelined tiled path for
            # huge odd-H masks instead of one un-pipelined whole-array block.
        out2d = pl.pallas_call(
            functools.partial(_full_kernel, h, w),
            out_shape=jax.ShapeDtypeStruct((h, w), jnp.float32),
            in_specs=[smem_spec,
                      pl.BlockSpec(memory_space=pltpu.MemorySpace.VMEM)],
            out_specs=pl.BlockSpec(memory_space=pltpu.MemorySpace.VMEM),
            compiler_params=cp,
            cost_estimate=cost,
        )(slope_arr, logits)

    return out2d.reshape(1, h, w)


# ---------------------------------------------------------------------------
# Deterministic parameter init, mirroring _slope_random_uniform in __init__:
#   temp   ~ U(eps, 1 - eps)
#   logits = -log(1/temp - 1) / slope, reshaped to (1, H, W)
# ---------------------------------------------------------------------------
def init_mask_logits(key, shape, slope=5.0, eps=0.01):
    h, w = shape
    temp = jax.random.uniform(
        key, (h, w), dtype=jnp.float32, minval=eps, maxval=1.0 - eps
    )
    logits = -jnp.log(1.0 / temp - 1.0) / slope
    return logits.reshape(1, h, w)


def _reference_forward(mask_logits, x, slope=5.0):
    """Pure-JAX reference for a correctness check."""
    h, w = int(x.shape[-2]), int(x.shape[-1])
    logits = mask_logits.reshape(1, h, w).astype(jnp.float32)
    prob = jax.nn.sigmoid(slope * logits)
    return jnp.fft.fftshift(prob, axes=(-2, -1))


if __name__ == "__main__":
    key = jax.random.PRNGKey(0)
    k_mask, k_x = jax.random.split(key)
    slope = 5.0

    # Small NHWC-like input; only the trailing two dims matter.
    x = jax.random.normal(k_x, (2, 4, 16, 16), dtype=jnp.float32)
    h, w = x.shape[-2], x.shape[-1]
    mask_logits = init_mask_logits(k_mask, (h, w), slope=slope)

    # 1) Whole-array fast path (typical small LOUPE mask).
    out = prob_mask_multi_accn_forward(mask_logits, x, slope=slope)
    out = jax.block_until_ready(out)
    ref = _reference_forward(mask_logits, x, slope=slope)
    assert out.shape == (1, h, w)
    assert jnp.allclose(out, ref, atol=3e-5, rtol=1e-5), float(
        jnp.max(jnp.abs(out - ref))
    )

    # 2) Tiled streaming path with both fftshift halves folded into the grid
    #    (W % 256 == 0), forced by shrinking the single-block budget.
    x2 = jnp.zeros((1, 1, 256, 256), dtype=jnp.float32)
    logits2 = init_mask_logits(jax.random.PRNGKey(1), (256, 256), slope=slope)
    out2 = prob_mask_multi_accn_forward(
        logits2, x2, slope=slope, whole_array_budget_bytes=0
    )
    out2 = jax.block_until_ready(out2)
    ref2 = _reference_forward(logits2, x2, slope=slope)
    assert jnp.allclose(out2, ref2, atol=3e-5, rtol=1e-5), float(
        jnp.max(jnp.abs(out2 - ref2))
    )

    # 3) Tiled path with in-kernel W roll (W % 128 == 0 but not 256).
    x3 = jnp.zeros((1, 1, 128, 128), dtype=jnp.float32)
    logits3 = init_mask_logits(jax.random.PRNGKey(2), (128, 128), slope=slope)
    out3 = prob_mask_multi_accn_forward(
        logits3, x3, slope=slope, whole_array_budget_bytes=0
    )
    out3 = jax.block_until_ready(out3)
    ref3 = _reference_forward(logits3, x3, slope=slope)
    assert jnp.allclose(out3, ref3, atol=3e-5, rtol=1e-5), float(
        jnp.max(jnp.abs(out3 - ref3))
    )

    print("KERNEL_OK")
</pallas_src>

<mosaic_0001>
module attributes {stable_mosaic.version = 11 : i64} {
  func.func @_full_kernel(%arg0: memref<1xf32, #tpu.memory_space<smem>>, %arg1: memref<16x16xf32, #tpu.memory_space<vmem>>, %arg2: memref<16x16xf32, #tpu.memory_space<vmem>>) attributes {dimension_semantics = [], scalar_prefetch = 0 : i64, scratch_operands = 0 : i64, tpu.core_type = #tpu.core_type<tc>} {
    %c0 = arith.constant 0 : index
    %c0_0 = arith.constant 0 : index
    %0 = vector.load %arg1[%c0, %c0_0] : memref<16x16xf32, #tpu.memory_space<vmem>>, vector<16x16xf32>
    %c0_1 = arith.constant 0 : index
    %1 = memref.load %arg0[%c0_1] : memref<1xf32, #tpu.memory_space<smem>>
    %cst = arith.constant 5.000000e-01 : f32
    %2 = arith.mulf %cst, %1 : f32
    %3 = vector.broadcast %2 : f32 to vector<16x16xf32>
    %4 = arith.mulf %3, %0 : vector<16x16xf32>
    %5 = math.tanh %4 : vector<16x16xf32>
    %cst_2 = arith.constant 5.000000e-01 : f32
    %6 = vector.broadcast %cst_2 : f32 to vector<16x16xf32>
    %7 = arith.mulf %6, %5 : vector<16x16xf32>
    %cst_3 = arith.constant 5.000000e-01 : f32
    %8 = vector.broadcast %cst_3 : f32 to vector<16x16xf32>
    %9 = arith.addf %7, %8 : vector<16x16xf32>
    %c8_i32 = arith.constant 8 : i32
    %10 = tpu.dynamic_rotate %9 by %c8_i32 dim 0 : vector<16x16xf32>, i32 -> vector<16x16xf32>
    %11 = vector.extract_strided_slice %10 {offsets = [0, 8], sizes = [16, 8], strides = [1, 1]} : vector<16x16xf32> to vector<16x8xf32>
    %12 = vector.extract_strided_slice %10 {offsets = [0, 0], sizes = [16, 8], strides = [1, 1]} : vector<16x16xf32> to vector<16x8xf32>
    %13 = tpu.concatenate %11, %12 in 1 : vector<16x8xf32>, vector<16x8xf32> -> vector<16x16xf32>
    %c0_4 = arith.constant 0 : index
    %c0_5 = arith.constant 0 : index
    %14 = vector.load %arg2[%c0_4, %c0_5] : memref<16x16xf32, #tpu.memory_space<vmem>>, vector<16x16xf32>
    tpu.vector_store %arg2[%c0_4, %c0_5], %13 {strides = array<i32>} : memref<16x16xf32, #tpu.memory_space<vmem>>, vector<16x16xf32>,
    return
  }
}

</mosaic_0001>

<bundles_post_ra>
// kernel: tpu_custom_call.1
= control target key start
LH: loop header
LB: loop body
LE: loop exit
PB: predicated region body
PF: predicated region fallthrough
CT: control target
= control target key end

     0   :  { %8 = vsyncpa [#allocation4], 0  ;;  %s179_s0 = inlined_call_operand.<no memory space> [shape: f32[1], index: 0, kind: input, shape index: {}]   ;;  %s180_s1 = inlined_call_operand.hbm [shape: f32[16,16], index: 1, kind: input, shape index: {}]   ;;  %s181_s2 = inlined_call_operand.hbm [shape: f32[16,16], index: 2, kind: output, shape index: {}]  }
   0x1   :  { %9 = vsyncpa [#allocation5], 0  ;;  %s16_s11 = sshll.u32 %s180_s1, 4  ;;  %s142_s12 = smov [#allocation3]   ;;  %s17_s11 = int_to_ptr.hbm [resolvable:$true] %s16_s11 }
   0x2   :  { %s18_s13 = sshll.u32 %s142_s12, 4  ;;  %s143_s14 = smov 128   ;;  %s19_s13 = int_to_ptr.vmem [resolvable:$true] %s18_s13 }
   0x3   :  { %s144_s15 = smov 8  }
   0x4   :  { %24 = dma.hbm_to_vmem [thread:$0]  %s17_s11, 256, %s19_s13, [#allocation4], %s143_s14, %s143_s14, %s144_s15  }
   0x5   :  { %138 = dma.done.wait [#allocation4], 256  }
   0x6   :  { %139 = vsyncadd [#allocation4], 4294967040  ;;  %s32_s18 = smul.f32 0.5, %s179_s0  ;;  %v30_v1 = vld [vmem:[#allocation3 + $0x8] sm:$0xff]  ;;  %v29_v2 = vld [vmem:[#allocation3] sm:$0xff]  ;;  %s145_s1 = smov 120  }
   0x7   :  { %vm56_vm0 = vcmask 64512   ;;  %vm59_vm1 = vcmask 130048   ;;  %s146_s0 = smov [#allocation6]   ;;  %s68_s22 = sshll.u32 %s181_s2, 4  ;;  %s69_s22 = int_to_ptr.hbm [resolvable:$true] %s68_s22 }
   0x8   :  { %v33_v0 = vstv %s32_s18  ;;  %s66_s19 = sshll.u32 %s146_s0, 4  ;;  %s67_s19 = int_to_ptr.vmem [resolvable:$true] %s66_s19 }
   0x9   :  { %v35_v3 = vmul.f32 %v33_v0, %v30_v1  ;;  %v34_v4 = vmul.f32 %v33_v0, %v29_v2 }
   0xb   :  { %86 = vtanh.f32 %v35_v3 }
   0xc   :  { %88 = vtanh.f32 %v34_v4 }
  0x11   :  { %v87_v5 = vpop.eup %86 }
  0x12   :  { %v39_v6 = vmul.f32 0.5, %v87_v5  ;;  %v89_v7 = vpop.eup %88 }
  0x13   :  { %v38_v9 = vmul.f32 0.5, %v89_v7 }
  0x14   :  { %v41_v8 = vadd.f32 0.5, %v39_v6 }
  0x15   :  { %v40_v10 = vadd.f32 0.5, %v38_v9 }
  0x16   :  { %50 = vrot.lane.b32.xlu1 %v41_v8, %s144_s15  ;;  %44 = vrot.lane.b32.xlu0 %v41_v8, %s145_s1 }
  0x1e   :  { %52 = vrot.lane.b32.xlu1 %v40_v10, %s144_s15  ;;  %46 = vrot.lane.b32.xlu0 %v40_v10, %s145_s1 }
  0x88   :  { %v51_v11 = vpop.permute.xlu1 %50  ;;  %v45_v12 = vpop.permute.xlu0 %44 }
  0x89   :  { %v57_v13 = vsel %vm56_vm0, %v45_v12, %v51_v11 }
  0x8a   :  { %60 = vst.msk [vmem:[#allocation6] sm:$0xff] %vm59_vm1, %v57_v13 }
  0x90   :  { %v53_v14 = vpop.permute.xlu1 %52  ;;  %v47_v15 = vpop.permute.xlu0 %46 }
  0x91   :  { %v58_v16 = vsel %vm56_vm0, %v47_v15, %v53_v14 }
  0x92   :  { %61 = vst.msk [vmem:[#allocation6 + $0x8] sm:$0xff] %vm59_vm1, %v58_v16 }
  0x93   :  { %74 = dma.vmem_to_hbm [thread:$0]  %s67_s19, 256, %s69_s22, [#allocation5], %s143_s14, %s143_s14, %s144_s15  }
  0x94   :  { %140 = dma.done.wait [#allocation5], 256  }
  0x95   :  { %141 = vsyncadd [#allocation5], 4294967040 }
  0x96   :  { %79 = vsyncpa [#allocation4], 1 }
  0x97   :  { %80 = vsyncpa [#allocation5], 1 }

</bundles_post_ra>
